<compile_context>
chip_gen: v5e
topology: v5e:2x2
jax: 0.10.0
libtpu: 0.0.40
codegen_flags: <defaults>
</compile_context>

<pallas_src>
import numpy as np
import jax
import jax.numpy as jnp
from jax.experimental import pallas as pl
from jax.experimental.pallas import tpu as pltpu


def _round_up(x, m):
    return ((x + m - 1) // m) * m


# --------------------------------------------------------------------------
# Kernel: one grid step == one tree level (deepest level first).
# --------------------------------------------------------------------------
def _treelstm_level_kernel(
    # VMEM inputs (per-level blocks / resident weights)
    x_ref,       # (Lpad, in_pad)      node features of this level
    hc_ref,      # (Lpad, 1)           1.0 if node has >=1 child else 0.0
    t_ref,       # (1, Lpad, Lpad)     one-hot child->parent scatter matrix
    w_ref,       # (in_pad, 3*Hp)      packed [Wi | Wo | Wu]
    u_ref,       # (Hp, 3*Hp)          packed [Ui | Uo | Uu]
    uf_ref,      # (Hp, Hp)            U_f weight
    biou_ref,    # (1, 3*Hp)           packed b_iou
    bf_ref,      # (1, Hp)             U_f bias
    # VMEM output
    h_ref,       # (Lpad, Hp)          hidden state of this level
    # VMEM scratch (persists across grid steps)
    hsum_ref,    # (Lpad, Hp)          sum of children h for *this* level
    csum_ref,    # (Lpad, Hp)          sum of f*c of children for *this* level
):
    lvl = pl.program_id(0)
    n_lvl = pl.num_programs(0)
    Hp = h_ref.shape[1]

    # Deepest level has no children yet: child-sum state starts at zero.
    @pl.when(lvl == 0)
    def _():
        hsum_ref[...] = jnp.zeros_like(hsum_ref)
        csum_ref[...] = jnp.zeros_like(csum_ref)

    hsum = hsum_ref[...]
    csum = csum_ref[...]

    # Batched gate matmuls for the whole level (MXU).
    xg = jnp.dot(x_ref[...], w_ref[...], preferred_element_type=jnp.float32)
    hg = jnp.dot(hsum, u_ref[...], preferred_element_type=jnp.float32)

    # reduce_func overwrites iou for nodes with children; leaves keep W_iou(x).
    m = (hc_ref[...] > 0.0).astype(jnp.float32)          # (Lpad, 1) broadcast
    g = xg + m * (hg - xg) + biou_ref[...]                # (Lpad, 3*Hp)

    i_g = jax.nn.sigmoid(g[:, 0:Hp])
    o_g = jax.nn.sigmoid(g[:, Hp:2 * Hp])
    u_g = jnp.tanh(g[:, 2 * Hp:3 * Hp])
    c = i_g * u_g + csum
    h = o_g * jnp.tanh(c)
    h_ref[...] = h

    # Scatter this level's (h, f*c) into its parents' child-sum state.
    # Parents of level l live exactly in level l+1, so a single assignment of
    # T @ h / T @ (f*c) fully builds the next level's hsum/csum.
    # Skipped for the root level (no parents).
    @pl.when(lvl + 1 < n_lvl)
    def _():
        f = jax.nn.sigmoid(
            jnp.dot(h, uf_ref[...], preferred_element_type=jnp.float32)
            + bf_ref[...])
        t = t_ref[0]                                      # (Lpad, Lpad)
        hsum_ref[...] = jnp.dot(t, h, preferred_element_type=jnp.float32)
        csum_ref[...] = jnp.dot(t, f * c, preferred_element_type=jnp.float32)


# --------------------------------------------------------------------------
# Wrapper: one ChildSum Tree-LSTM layer over the whole (padded) tree.
# --------------------------------------------------------------------------
def treelstm_layer(xp, hc, T, layer, num_levels, lpad, Hp):
    R, in_pad = xp.shape
    return pl.pallas_call(
        _treelstm_level_kernel,
        out_shape=jax.ShapeDtypeStruct((R, Hp), jnp.float32),
        grid_spec=pltpu.PrefetchScalarGridSpec(
            num_scalar_prefetch=0,
            grid=(num_levels,),
            in_specs=[
                pl.BlockSpec((lpad, in_pad), lambda l: (l, 0)),       # x
                pl.BlockSpec((lpad, 1), lambda l: (l, 0)),            # haschild
                pl.BlockSpec((1, lpad, lpad), lambda l: (l, 0, 0)),   # scatter
                pl.BlockSpec((in_pad, 3 * Hp), lambda l: (0, 0)),     # W pack
                pl.BlockSpec((Hp, 3 * Hp), lambda l: (0, 0)),         # U pack
                pl.BlockSpec((Hp, Hp), lambda l: (0, 0)),             # U_f
                pl.BlockSpec((1, 3 * Hp), lambda l: (0, 0)),          # b_iou
                pl.BlockSpec((1, Hp), lambda l: (0, 0)),              # b_f
            ],
            out_specs=pl.BlockSpec((lpad, Hp), lambda l: (l, 0)),
            scratch_shapes=[
                pltpu.VMEM((lpad, Hp), jnp.float32),   # hsum (child h sums)
                pltpu.VMEM((lpad, Hp), jnp.float32),   # csum (child f*c sums)
            ],
        ),
        compiler_params=pltpu.CompilerParams(
            dimension_semantics=("arbitrary",),        # sequential over levels
            vmem_limit_bytes=32 * 1024 * 1024,
        ),
    )(xp, hc, T, layer["w_pack"], layer["u_pack"], layer["uf"],
      layer["biou"], layer["bf"])


def tree_lstm_forward(x, sched, params, hidden_size, Hp):
    n, in_dim = x.shape
    R, lpad, L = sched["R"], sched["lpad"], sched["num_levels"]
    slot = sched["slot"]
    in_pad = _round_up(in_dim, 128)

    # Permute node features into padded level-major layout, pad lanes to 128.
    xp = jnp.zeros((R, in_pad), jnp.float32)
    xp = xp.at[slot, :in_dim].set(x.astype(jnp.float32))

    cur = xp
    for layer in params:
        cur = treelstm_layer(cur, sched["hc"], sched["T"], layer, L, lpad, Hp)

    # Gather back to original node order, drop lane padding.
    return cur[slot, :hidden_size]


# --------------------------------------------------------------------------
# Host-side tree construction / level schedule.
# --------------------------------------------------------------------------
def build_tree(n):
    # Deterministic complete binary tree; edges point child -> parent.
    parent = np.full((n,), -1, np.int32)
    for i in range(1, n):
        parent[i] = (i - 1) // 2
    depth = np.zeros(n, np.int32)
    for i in range(1, n):
        depth[i] = depth[parent[i]] + 1
    # Topological order (children before parents) for the numpy reference.
    order = np.argsort(-depth, kind="stable").astype(np.int32)
    haschild = np.zeros(n, np.int32)
    for i in range(1, n):
        haschild[parent[i]] = 1
    return parent, depth, order, haschild


def build_level_schedule(parent, depth, haschild):
    n = len(parent)
    maxd = int(depth.max())
    num_levels = maxd + 1
    lvl_of = (maxd - depth).astype(np.int64)      # level 0 = deepest
    level_nodes = [np.where(lvl_of == l)[0] for l in range(num_levels)]
    lmax = max(len(v) for v in level_nodes)
    lpad = _round_up(max(lmax, 1), 8)             # sublane-aligned level width
    R = num_levels * lpad

    slot = np.zeros((n,), np.int64)               # node -> padded row
    for l, nodes in enumerate(level_nodes):
        for j, v in enumerate(nodes):
            slot[v] = l * lpad + j

    hc = np.zeros((R, 1), np.float32)
    hc[slot, 0] = haschild.astype(np.float32)

    # T[l, k, j] = 1  iff slot j of level l has its parent at slot k of level l+1.
    T = np.zeros((num_levels, lpad, lpad), np.float32)
    for l in range(num_levels - 1):
        for j, v in enumerate(level_nodes[l]):
            p = int(parent[v])
            if p >= 0:
                k = int(slot[p] - (l + 1) * lpad)
                assert 0 <= k < lpad
                T[l, k, j] = 1.0

    return dict(num_levels=num_levels, lpad=lpad, R=R, slot=slot,
                hc=jnp.asarray(hc), T=jnp.asarray(T))


# --------------------------------------------------------------------------
# Parameters (same shapes as the PyTorch module, plus packed/padded copies).
# --------------------------------------------------------------------------
def init_treelstm_params(key, input_size, hidden_size, num_layers, Hp):
    H = hidden_size
    params = []
    for li in range(num_layers):
        in_dim = input_size if li == 0 else hidden_size
        in_pad = _round_up(input_size, 128) if li == 0 else Hp
        key, k1, k2, k3, k4 = jax.random.split(key, 5)
        W_iou = np.asarray(jax.random.normal(k1, (3 * H, in_dim), jnp.float32)) * 0.1
        U_iou = np.asarray(jax.random.normal(k2, (3 * H, H), jnp.float32)) * 0.1
        Uf_w = np.asarray(jax.random.normal(k3, (H, H), jnp.float32)) * 0.1
        Uf_b = np.asarray(jax.random.normal(k4, (H,), jnp.float32)) * 0.1
        b_iou = np.zeros((1, 3 * H), np.float32)          # Parameter(zeros)

        # Pack gate weights into fused, lane-padded slabs (x @ W convention).
        w_pack = np.zeros((in_pad, 3 * Hp), np.float32)
        u_pack = np.zeros((Hp, 3 * Hp), np.float32)
        biou = np.zeros((1, 3 * Hp), np.float32)
        Wt, Ut = W_iou.T, U_iou.T
        for g in range(3):
            w_pack[:in_dim, g * Hp:g * Hp + H] = Wt[:, g * H:(g + 1) * H]
            u_pack[:H, g * Hp:g * Hp + H] = Ut[:, g * H:(g + 1) * H]
            biou[:, g * Hp:g * Hp + H] = b_iou[:, g * H:(g + 1) * H]
        uf = np.zeros((Hp, Hp), np.float32)
        uf[:H, :H] = Uf_w.T
        bf = np.zeros((1, Hp), np.float32)
        bf[0, :H] = Uf_b

        params.append(dict(
            torch=dict(W_iou=W_iou, U_iou=U_iou, Uf_w=Uf_w, Uf_b=Uf_b, b_iou=b_iou),
            w_pack=jnp.asarray(w_pack), u_pack=jnp.asarray(u_pack),
            uf=jnp.asarray(uf), biou=jnp.asarray(biou), bf=jnp.asarray(bf)))
    return params


# --------------------------------------------------------------------------
# Pure-numpy reference (per-node sequential, mirrors the PyTorch semantics).
# --------------------------------------------------------------------------
def _sigmoid(v):
    return 1.0 / (1.0 + np.exp(-v))


def reference_forward(x, parent, order, haschild, params, H):
    x = np.asarray(x, np.float32)
    for layer in params:
        t = layer["torch"]
        W_iou, U_iou = np.asarray(t["W_iou"]), np.asarray(t["U_iou"])
        Uf_w, Uf_b = np.asarray(t["Uf_w"]), np.asarray(t["Uf_b"])
        b_iou = np.asarray(t["b_iou"])
        N = x.shape[0]
        iou0 = x @ W_iou.T
        h = np.zeros((N, H), np.float32)
        hsum = np.zeros((N, H), np.float32)
        csum = np.zeros((N, H), np.float32)
        for v in order:
            v = int(v)
            iou = (hsum[v] @ U_iou.T) if haschild[v] else iou0[v]
            iou = iou + b_iou[0]
            i, o, u = iou[:H], iou[H:2 * H], iou[2 * H:]
            i, o, u = _sigmoid(i), _sigmoid(o), np.tanh(u)
            c_v = i * u + csum[v]
            h_v = o * np.tanh(c_v)
            h[v] = h_v
            p = int(parent[v])
            if p >= 0:
                f = _sigmoid(h_v @ Uf_w.T + Uf_b)
                hsum[p] += h_v
                csum[p] += f * c_v
        x = h
    return x


if __name__ == "__main__":
    input_size, hidden_size, num_layers = 16, 32, 2
    n_nodes = 15
    Hp = _round_up(hidden_size, 128)

    parent_np, depth_np, order_np, haschild_np = build_tree(n_nodes)
    sched = build_level_schedule(parent_np, depth_np, haschild_np)

    key = jax.random.PRNGKey(0)
    key, kx = jax.random.split(key)
    x = jax.random.normal(kx, (n_nodes, input_size), jnp.float32)
    params = init_treelstm_params(key, input_size, hidden_size, num_layers, Hp)

    out = tree_lstm_forward(x, sched, params, hidden_size, Hp)
    out = jax.block_until_ready(out)

    ref = reference_forward(np.asarray(x), parent_np, order_np, haschild_np,
                            params, hidden_size)
    np.testing.assert_allclose(np.asarray(out), ref, rtol=1e-4, atol=1e-4)
    print("KERNEL_OK")
</pallas_src>

<mosaic_0001>
module attributes {stable_mosaic.version = 11 : i64} {
  func.func @_treelstm_level_kernel(%arg0: i32, %arg1: memref<8x128xf32, #tpu.memory_space<vmem>>, %arg2: memref<8x1xf32, #tpu.memory_space<vmem>>, %arg3: memref<1x8x8xf32, #tpu.memory_space<vmem>>, %arg4: memref<128x384xf32, #tpu.memory_space<vmem>>, %arg5: memref<128x384xf32, #tpu.memory_space<vmem>>, %arg6: memref<128x128xf32, #tpu.memory_space<vmem>>, %arg7: memref<1x384xf32, #tpu.memory_space<vmem>>, %arg8: memref<1x128xf32, #tpu.memory_space<vmem>>, %arg9: memref<8x128xf32, #tpu.memory_space<vmem>>, %arg10: memref<8x128xf32, #tpu.memory_space<vmem>>, %arg11: memref<8x128xf32, #tpu.memory_space<vmem>>) attributes {dimension_semantics = [#tpu.dimension_semantics<arbitrary>], iteration_bounds = array<i64: 4>, scalar_prefetch = 0 : i64, scratch_operands = 2 : i64, tpu.core_type = #tpu.core_type<tc>, window_params = [{transform_indices = @transform_0, window_bounds = array<i64: 8, 128>}, {transform_indices = @transform_1, window_bounds = array<i64: 8, 1>}, {transform_indices = @transform_2, window_bounds = array<i64: 1, 8, 8>}, {pipeline_mode = #tpu.pipeline_mode<synchronous>, transform_indices = @transform_3, window_bounds = array<i64: 128, 384>}, {pipeline_mode = #tpu.pipeline_mode<synchronous>, transform_indices = @transform_4, window_bounds = array<i64: 128, 384>}, {pipeline_mode = #tpu.pipeline_mode<synchronous>, transform_indices = @transform_5, window_bounds = array<i64: 128, 128>}, {pipeline_mode = #tpu.pipeline_mode<synchronous>, transform_indices = @transform_6, window_bounds = array<i64: 1, 384>}, {pipeline_mode = #tpu.pipeline_mode<synchronous>, transform_indices = @transform_7, window_bounds = array<i64: 1, 128>}, {transform_indices = @transform_8, window_bounds = array<i64: 8, 128>}]} {
    %c0_i32 = arith.constant 0 : i32
    %0 = arith.cmpi eq, %arg0, %c0_i32 : i32
    %1 = arith.extui %0 : i1 to i32
    %c0_i32_0 = arith.constant 0 : i32
    %2 = arith.cmpi ne, %1, %c0_i32_0 : i32
    scf.if %2 {
      %cst_21 = arith.constant 0.000000e+00 : f32
      %45 = vector.broadcast %cst_21 : f32 to vector<8x128xf32>
      %c0_22 = arith.constant 0 : index
      %c0_23 = arith.constant 0 : index
      %46 = vector.load %arg10[%c0_22, %c0_23] : memref<8x128xf32, #tpu.memory_space<vmem>>, vector<8x128xf32>
      tpu.vector_store %arg10[%c0_22, %c0_23], %45 {strides = array<i32>} : memref<8x128xf32, #tpu.memory_space<vmem>>, vector<8x128xf32>,
      %cst_24 = arith.constant 0.000000e+00 : f32
      %47 = vector.broadcast %cst_24 : f32 to vector<8x128xf32>
      %c0_25 = arith.constant 0 : index
      %c0_26 = arith.constant 0 : index
      %48 = vector.load %arg11[%c0_25, %c0_26] : memref<8x128xf32, #tpu.memory_space<vmem>>, vector<8x128xf32>
      tpu.vector_store %arg11[%c0_25, %c0_26], %47 {strides = array<i32>} : memref<8x128xf32, #tpu.memory_space<vmem>>, vector<8x128xf32>,
    } else {
    }
    %c0 = arith.constant 0 : index
    %c0_1 = arith.constant 0 : index
    %3 = vector.load %arg10[%c0, %c0_1] : memref<8x128xf32, #tpu.memory_space<vmem>>, vector<8x128xf32>
    %c0_2 = arith.constant 0 : index
    %c0_3 = arith.constant 0 : index
    %4 = vector.load %arg11[%c0_2, %c0_3] : memref<8x128xf32, #tpu.memory_space<vmem>>, vector<8x128xf32>
    %c0_4 = arith.constant 0 : index
    %c0_5 = arith.constant 0 : index
    %5 = vector.load %arg1[%c0_4, %c0_5] : memref<8x128xf32, #tpu.memory_space<vmem>>, vector<8x128xf32>
    %c0_6 = arith.constant 0 : index
    %c0_7 = arith.constant 0 : index
    %6 = vector.load %arg4[%c0_6, %c0_7] : memref<128x384xf32, #tpu.memory_space<vmem>>, vector<128x384xf32>
    %cst = arith.constant dense<0.000000e+00> : vector<8x384xf32>
    %7 = tpu.matmul %5, %6, %cst {dimension_numbers = #tpu.dot_dimension_numbers<[1], [0], [0], [1], [0, 0, 1, 1], [], []>} : vector<8x128xf32>, vector<128x384xf32>, vector<8x384xf32> -> vector<8x384xf32>
    %c0_8 = arith.constant 0 : index
    %c0_9 = arith.constant 0 : index
    %8 = vector.load %arg5[%c0_8, %c0_9] : memref<128x384xf32, #tpu.memory_space<vmem>>, vector<128x384xf32>
    %cst_10 = arith.constant dense<0.000000e+00> : vector<8x384xf32>
    %9 = tpu.matmul %3, %8, %cst_10 {dimension_numbers = #tpu.dot_dimension_numbers<[1], [0], [0], [1], [0, 0, 1, 1], [], []>} : vector<8x128xf32>, vector<128x384xf32>, vector<8x384xf32> -> vector<8x384xf32>
    %c0_11 = arith.constant 0 : index
    %c0_12 = arith.constant 0 : index
    %10 = vector.load %arg2[%c0_11, %c0_12] : memref<8x1xf32, #tpu.memory_space<vmem>>, vector<8x1xf32>
    %cst_13 = arith.constant 0.000000e+00 : f32
    %11 = vector.broadcast %cst_13 : f32 to vector<8x1xf32>
    %12 = arith.cmpf ogt, %10, %11 : vector<8x1xf32>
    %13 = arith.extui %12 : vector<8x1xi1> to vector<8x1xi32>
    %14 = arith.sitofp %13 : vector<8x1xi32> to vector<8x1xf32>
    %15 = arith.subf %9, %7 : vector<8x384xf32>
    %16 = vector.broadcast %14 : vector<8x1xf32> to vector<8x384xf32>
    %17 = arith.mulf %16, %15 : vector<8x384xf32>
    %18 = arith.addf %7, %17 : vector<8x384xf32>
    %c0_14 = arith.constant 0 : index
    %c0_15 = arith.constant 0 : index
    %19 = vector.load %arg7[%c0_14, %c0_15] : memref<1x384xf32, #tpu.memory_space<vmem>>, vector<1x384xf32>
    %20 = vector.broadcast %19 : vector<1x384xf32> to vector<8x384xf32>
    %21 = arith.addf %18, %20 : vector<8x384xf32>
    %22 = vector.extract_strided_slice %21 {offsets = [0, 0], sizes = [8, 128], strides = [1, 1]} : vector<8x384xf32> to vector<8x128xf32>
    %23 = arith.negf %22 : vector<8x128xf32>
    %24 = math.exp %23 : vector<8x128xf32>
    %cst_16 = arith.constant 1.000000e+00 : f32
    %25 = vector.broadcast %cst_16 : f32 to vector<8x128xf32>
    %26 = arith.addf %25, %24 : vector<8x128xf32>
    %27 = arith.divf %25, %26 : vector<8x128xf32>
    %28 = vector.extract_strided_slice %21 {offsets = [0, 128], sizes = [8, 128], strides = [1, 1]} : vector<8x384xf32> to vector<8x128xf32>
    %29 = arith.negf %28 : vector<8x128xf32>
    %30 = math.exp %29 : vector<8x128xf32>
    %cst_17 = arith.constant 1.000000e+00 : f32
    %31 = vector.broadcast %cst_17 : f32 to vector<8x128xf32>
    %32 = arith.addf %31, %30 : vector<8x128xf32>
    %33 = arith.divf %31, %32 : vector<8x128xf32>
    %34 = vector.extract_strided_slice %21 {offsets = [0, 256], sizes = [8, 128], strides = [1, 1]} : vector<8x384xf32> to vector<8x128xf32>
    %35 = math.tanh %34 : vector<8x128xf32>
    %36 = arith.mulf %27, %35 : vector<8x128xf32>
    %37 = arith.addf %36, %4 : vector<8x128xf32>
    %38 = math.tanh %37 : vector<8x128xf32>
    %39 = arith.mulf %33, %38 : vector<8x128xf32>
    %c0_18 = arith.constant 0 : index
    %c0_19 = arith.constant 0 : index
    %40 = vector.load %arg9[%c0_18, %c0_19] : memref<8x128xf32, #tpu.memory_space<vmem>>, vector<8x128xf32>
    tpu.vector_store %arg9[%c0_18, %c0_19], %39 {strides = array<i32>} : memref<8x128xf32, #tpu.memory_space<vmem>>, vector<8x128xf32>,
    %c1_i32 = arith.constant 1 : i32
    %41 = arith.addi %arg0, %c1_i32 : i32
    %c4_i32 = arith.constant 4 : i32
    %42 = arith.cmpi slt, %41, %c4_i32 : i32
    %43 = arith.extui %42 : i1 to i32
    %c0_i32_20 = arith.constant 0 : i32
    %44 = arith.cmpi ne, %43, %c0_i32_20 : i32
    scf.if %44 {
      %c0_21 = arith.constant 0 : index
      %c0_22 = arith.constant 0 : index
      %45 = vector.load %arg6[%c0_21, %c0_22] : memref<128x128xf32, #tpu.memory_space<vmem>>, vector<128x128xf32>
      %cst_23 = arith.constant dense<0.000000e+00> : vector<8x128xf32>
      %46 = tpu.matmul %39, %45, %cst_23 {dimension_numbers = #tpu.dot_dimension_numbers<[1], [0], [0], [1], [0, 0, 1, 1], [], []>} : vector<8x128xf32>, vector<128x128xf32>, vector<8x128xf32> -> vector<8x128xf32>
      %c0_24 = arith.constant 0 : index
      %c0_25 = arith.constant 0 : index
      %47 = vector.load %arg8[%c0_24, %c0_25] : memref<1x128xf32, #tpu.memory_space<vmem>>, vector<1x128xf32>
      %48 = vector.broadcast %47 : vector<1x128xf32> to vector<8x128xf32>
      %49 = arith.addf %46, %48 : vector<8x128xf32>
      %50 = arith.negf %49 : vector<8x128xf32>
      %51 = math.exp %50 : vector<8x128xf32>
      %cst_26 = arith.constant 1.000000e+00 : f32
      %52 = vector.broadcast %cst_26 : f32 to vector<8x128xf32>
      %53 = arith.addf %52, %51 : vector<8x128xf32>
      %54 = arith.divf %52, %53 : vector<8x128xf32>
      %c0_27 = arith.constant 0 : index
      %c0_28 = arith.constant 0 : index
      %c0_29 = arith.constant 0 : index
      %55 = vector.load %arg3[%c0_27, %c0_28, %c0_29] : memref<1x8x8xf32, #tpu.memory_space<vmem>>, vector<1x8x8xf32>
      %56 = vector.shape_cast %55 : vector<1x8x8xf32> to vector<8x8xf32>
      %cst_30 = arith.constant dense<0.000000e+00> : vector<8x128xf32>
      %57 = tpu.matmul %56, %39, %cst_30 {dimension_numbers = #tpu.dot_dimension_numbers<[1], [0], [0], [1], [0, 0, 1, 1], [], []>} : vector<8x8xf32>, vector<8x128xf32>, vector<8x128xf32> -> vector<8x128xf32>
      %c0_31 = arith.constant 0 : index
      %c0_32 = arith.constant 0 : index
      %58 = vector.load %arg10[%c0_31, %c0_32] : memref<8x128xf32, #tpu.memory_space<vmem>>, vector<8x128xf32>
      tpu.vector_store %arg10[%c0_31, %c0_32], %57 {strides = array<i32>} : memref<8x128xf32, #tpu.memory_space<vmem>>, vector<8x128xf32>,
      %59 = arith.mulf %54, %37 : vector<8x128xf32>
      %cst_33 = arith.constant dense<0.000000e+00> : vector<8x128xf32>
      %60 = tpu.matmul %56, %59, %cst_33 {dimension_numbers = #tpu.dot_dimension_numbers<[1], [0], [0], [1], [0, 0, 1, 1], [], []>} : vector<8x8xf32>, vector<8x128xf32>, vector<8x128xf32> -> vector<8x128xf32>
      %c0_34 = arith.constant 0 : index
      %c0_35 = arith.constant 0 : index
      %61 = vector.load %arg11[%c0_34, %c0_35] : memref<8x128xf32, #tpu.memory_space<vmem>>, vector<8x128xf32>
      tpu.vector_store %arg11[%c0_34, %c0_35], %60 {strides = array<i32>} : memref<8x128xf32, #tpu.memory_space<vmem>>, vector<8x128xf32>,
    } else {
    }
    return
  }
  func.func @transform_0(%arg0: i32) -> (i32, i32) {
    %c0_i32 = arith.constant 0 : i32
    %c0_i32_0 = arith.constant 0 : i32
    return %arg0, %c0_i32 : i32, i32
  }
  func.func @transform_1(%arg0: i32) -> (i32, i32) {
    %c0_i32 = arith.constant 0 : i32
    %c0_i32_0 = arith.constant 0 : i32
    return %arg0, %c0_i32 : i32, i32
  }
  func.func @transform_2(%arg0: i32) -> (i32, i32, i32) {
    %c0_i32 = arith.constant 0 : i32
    %c0_i32_0 = arith.constant 0 : i32
    %c0_i32_1 = arith.constant 0 : i32
    return %arg0, %c0_i32, %c0_i32_0 : i32, i32, i32
  }
  func.func @transform_3(%arg0: i32) -> (i32, i32) {
    %c0_i32 = arith.constant 0 : i32
    %c0_i32_0 = arith.constant 0 : i32
    %c0_i32_1 = arith.constant 0 : i32
    return %c0_i32, %c0_i32_0 : i32, i32
  }
  func.func @transform_4(%arg0: i32) -> (i32, i32) {
    %c0_i32 = arith.constant 0 : i32
    %c0_i32_0 = arith.constant 0 : i32
    %c0_i32_1 = arith.constant 0 : i32
    return %c0_i32, %c0_i32_0 : i32, i32
  }
  func.func @transform_5(%arg0: i32) -> (i32, i32) {
    %c0_i32 = arith.constant 0 : i32
    %c0_i32_0 = arith.constant 0 : i32
    %c0_i32_1 = arith.constant 0 : i32
    return %c0_i32, %c0_i32_0 : i32, i32
  }
  func.func @transform_6(%arg0: i32) -> (i32, i32) {
    %c0_i32 = arith.constant 0 : i32
    %c0_i32_0 = arith.constant 0 : i32
    %c0_i32_1 = arith.constant 0 : i32
    return %c0_i32, %c0_i32_0 : i32, i32
  }
  func.func @transform_7(%arg0: i32) -> (i32, i32) {
    %c0_i32 = arith.constant 0 : i32
    %c0_i32_0 = arith.constant 0 : i32
    %c0_i32_1 = arith.constant 0 : i32
    return %c0_i32, %c0_i32_0 : i32, i32
  }
  func.func @transform_8(%arg0: i32) -> (i32, i32) {
    %c0_i32 = arith.constant 0 : i32
    %c0_i32_0 = arith.constant 0 : i32
    return %arg0, %c0_i32 : i32, i32
  }
}

</mosaic_0001>

<bundles_post_ra>
// kernel: tpu_custom_call.1
= control target key start
LH: loop header
LB: loop body
LE: loop exit
PB: predicated region body
PF: predicated region fallthrough
CT: control target
= control target key end

     0   :  { %s1535_s0 = inlined_call_operand.vmem [shape: f32[32,128], index: 0, kind: input, shape index: {}]   ;;  %s1536_s1 = inlined_call_operand.vmem [shape: f32[32,1], index: 1, kind: input, shape index: {}]   ;;  %s1537_s2 = inlined_call_operand.hbm [shape: f32[4,8,8], index: 2, kind: input, shape index: {}]   ;;  %s1538_s3 = inlined_call_operand.hbm [shape: f32[128,384], index: 3, kind: input, shape index: {}]   ;;  %s1539_s4 = inlined_call_operand.hbm [shape: f32[128,384], index: 4, kind: input, shape index: {}]   ;;  %s1540_s5 = inlined_call_operand.hbm [shape: f32[128,128], index: 5, kind: input, shape index: {}]   ;;  %s1541_s6 = inlined_call_operand.vmem [shape: f32[1,384], index: 6, kind: input, shape index: {}]   ;;  %s1542_s7 = inlined_call_operand.vmem [shape: f32[1,128], index: 7, kind: input, shape index: {}]   ;;  %s1543_s8 = inlined_call_operand.hbm [shape: f32[32,128], index: 8, kind: output, shape index: {}]  }
   0x1   :  { %1544 = sst [smem:[#allocation17_spill]] %s1538_s3 }
   0x2   :  { %1545 = sst [smem:[#allocation18_spill]] %s1539_s4 }
   0x3   :  { %13 = vsyncpa [#allocation5], 0 }
   0x4   :  { %15 = vsyncpa [#allocation5 + $0x1], 0 }
   0x5   :  { %16 = vsyncpa [#allocation8], 0 }
   0x6   :  { %17 = vsyncpa [#allocation11], 0 }
   0x7   :  { %18 = vsyncpa [#allocation6], 0 }
   0x8   :  { %20 = vsyncpa [#allocation6 + $0x1], 0  ;;  %s1337_s27 = smov 0   ;;  %s1339_s28 = smov 0  }
   0x9   :  { %s1341_s29 = smov 0   ;;  %s1343_s30 = smov 0  }
   0xa LB: > { %s1546_s3 = sld [smem:[#allocation17_spill]]  ;;  %s1361_s12 = sadd.s32 4294967295, %s1280_s30   ;;  %s1280_s30 = sphi %s1343_s30, %s1558_s30   ;;  %s1276_s29 = sphi %s1341_s29, %s1557_s29   ;;  %s1272_s28 = sphi %s1339_s28, %s1556_s28   ;;  %s1268_s27 = sphi %s1337_s27, %s1555_s27  }
   0xb   : > { %p957_p0 = scmp.ge.s32.totalorder %s1280_s30, 1  ;;  %p99_p1 = scmp.eq.s32.totalorder %s1361_s12, 0 }
   0xc   : > { %p240_p2 = scmp.lt.s32.totalorder %s1280_s30, 5  ;;  %s1282_s14 = smov [#allocation7]  }
   0xd   : > { %s253_s15 = sshll.u32 %s1282_s14, 4  ;;  %s1548_s4 = sld [smem:[#allocation18_spill]]  ;;  %s254_s15 = int_to_ptr.vmem [resolvable:$true] %s253_s15 }
   0xe   : > { %p1367_p4 = pnand %p957_p0, %p240_p2  ;;  %s279_s22 = sshll.u32 %s1540_s5, 4  ;;  %s280_s22 = int_to_ptr.hbm [resolvable:$true] %s279_s22 }
   0xf   : > { %s1283_s23 = smov [#allocation9]   ;;  %s1284_s25 = smov 384  }
  0x10   : > { %s251_s11 = sshll.u32 %s1546_s3, 4  ;;  %p1000_p5 = pneg %p1367_p4  ;;  %s252_s11 = int_to_ptr.hbm [resolvable:$true] %s251_s11 }
  0x11   : > { %s267_s24 = sshll.u32 %s1283_s23, 4  ;;  %s1285_s26 = smov 24   ;;  %s268_s24 = int_to_ptr.vmem [resolvable:$true] %s267_s24 }
  0x12   : > { %p1378_p6 = pnand %p1000_p5, %p99_p1  ;;  %s1286_s9 = smov [#allocation10]  }
  0x13   : > { %s265_s18 = sshll.u32 %s1548_s4, 4  ;;  %s281_s10 = sshll.u32 %s1286_s9, 4  ;;  %s266_s18 = int_to_ptr.hbm [resolvable:$true] %s265_s18  ;;  %s282_s10 = int_to_ptr.vmem [resolvable:$true] %s281_s10 }
  0x14   : > { %1003 = dma.hbm_to_vmem [thread:$0]  (!%p1378_p6), %s252_s11, 6144, %s254_s15, [#allocation8], %s1284_s25, %s1284_s25, %s1285_s26  }
  0x15   : > { %1006 = dma.hbm_to_vmem [thread:$0]  (!%p1378_p6), %s266_s18, 6144, %s268_s24, [#allocation8], %s1284_s25, %s1284_s25, %s1285_s26  }
  0x16   : > { %s1287_s14 = smov 128   ;;  %s1288_s16 = smov 8  }
  0x17   : > { %1009 = dma.hbm_to_vmem [thread:$0]  (!%p1378_p6), %s280_s22, 2048, %s282_s10, [#allocation11], %s1287_s14, %s1287_s14, %s1288_s16  }
  0x18   : > { %s956_s17 = sadd.s32 4294967294, %s1280_s30   ;;  %s1393_s11 = sadd.s32 1, %s1280_s30  }
  0x19   : > { %s85_s15 = sadd.s32 1, %s1276_s29  ;;  %s82_s20 = ssub.s32 %s1280_s30, %s1393_s11 }
  0x1a   : > { %p92_p7 = scmp.ne.s32.totalorder %s1276_s29, %s1272_s28  ;;  %p83_p8 = scmp.eq.s32.totalorder %s82_s20, 0 }
  0x1b   : > { %p93_p9 = scmp.eq.s32.totalorder %s1280_s30, 0  ;;  %p98_p10 = scmp.ne.s32.totalorder %s1272_s28, %s1268_s27 }
  0x1c   : > { %p227_p11 = scmp.eq.s32.totalorder %s1361_s12, 3  ;;  %p233_p0 = scmp.eq.s32.totalorder %s956_s17, 3 }
  0x1d   : > { %s1405_s18 = scalar_select %p83_p8, %s1276_s29, %s85_s15  }
  0x1e   : > { %p1409_p12 = por %p99_p1, %p98_p10  ;;  %p1413_p13 = por %p227_p11, %p92_p7 }
  0x1f   : > { %p94_p2 = por %p93_p9, %p92_p7  ;;  %s315_s22 = sand.u32 1, %s1276_s29  }
  0x20   : > { %p1418_p5 = por %p233_p0, %p98_p10  ;;  %p1021_p6 = scmp.lt.s32.totalorder %s1280_s30, 4 }
  0x21   : > { %s962_s24 = sshll.u32 %s315_s22, 3  ;;  %s963_s25 = sshll.u32 %s1280_s30, 3 }
  0x22   : > { %s323_s10 = scalar_lea.hbm %s1537_s2, %s963_s25  ;;  %s319_s16 = scalar_lea.vmem [#allocation4], %s962_s24 }
  0x23   : > { %s325_s14 = sshll.u32 %s323_s10, 4  ;;  %s327_s15 = sshll.u32 %s319_s16, 4  ;;  %s326_s14 = int_to_ptr.hbm [resolvable:$true] %s325_s14  ;;  %s328_s15 = int_to_ptr.vmem [resolvable:$true] %s327_s15 }
  0x24   : > { %p1427_p8 = pnand %p1021_p6, %p94_p2  ;;  %s316_s20 = scalar_lea.sflag [#allocation5], %s315_s22 }
  0x25   : > { %s1176_s3 = sshra.s32 %s326_s14, 4  ;;  %s1183_s24 = scalar_lea.hbm %s1537_s2, 32  ;;  %s1177_s3 = int_to_ptr.hbm [resolvable:$true] %s1176_s3 }
  0x26   : > { %s1178_s4 = scalar_lea.hbm %s1177_s3, 8  ;;  %p1180_p9 = pneg %p1427_p8 }
  0x27   : > { %p1179_p7 = scmp.ne.s32.totalorder %s1177_s3, %s1178_s4  ;;  %p1184_p0 = scmp.lt.s32.totalorder %s1177_s3, %s1537_s2 }
  0x28   : > { %p1185_p2 = scmp.lt.s32.totalorder %s1183_s24, %s1178_s4 }
  0x29   : > { %p1181_p10 = pnand %p1180_p9, %p1179_p7 }
  0x2a   : > { %p1186_p6 = por %p1185_p2, %p1184_p0 }
  0x2b   : > { %p1182_p11 = pneg %p1181_p10 }
  0x2d   : > { %p1187_p3 = pnand %p1186_p6, %p1182_p11 }
  0x2f   : > { %1190 = shalt.err (!%p1187_p3)
}
  0x30   : > { %1013 = dma.hbm_to_vmem [thread:$0]  (!%p1427_p8), %s326_s14, 128, %s328_s15, %s316_s20  }
  0x31   : > { %336 = sbr.rel (%p1367_p4) target bundleno = 638 (0x27e), region = 52  ;;  %s1444_s22 = sand.u32 (!%p1367_p4), 1, %s1272_s28  }
  0x32   : > { %s965_s16 = sshll.u32 (!%p1367_p4), %s1444_s22, 3  ;;  %s339_s25 = scalar_lea.sflag (!%p1367_p4), [#allocation5], %s1444_s22 }
  0x33   : > { %s1448_s26 = scalar_lea.vmem (!%p1367_p4), [#allocation4], %s965_s16 }
  0x36   : > { %1251 = dma.done.wait (%p1409_p12), %s339_s25, 128  }
  0x37   : > { %1253 = vsyncadd (%p1409_p12), %s339_s25, 4294967168 }
  0x38   : > { %1255 = dma.done.wait (%p99_p1), [#allocation8], 12288  }
  0x39   : > { %1257 = vsyncadd (%p99_p1), [#allocation8], 4294955008 }
  0x3a   : > { %1259 = dma.done.wait (%p99_p1), [#allocation11], 2048  }
  0x3b   : > { %1261 = vsyncadd (%p99_p1), [#allocation11], 4294965248  ;;  %p399_p3 = scmp.lt.s32.totalorder %s1361_s12, 3  ;;  %s1474_s24 = scalar_lea.vmem [#allocation12], %s965_s16 }
  0x3c   : > { %p1554_p4 = scmp.ne.s32.totalorder %s1361_s12, 0 }
  0x3d   : > { %s400_s3 = scalar_select %p399_p3, %s1361_s12, 3 }
  0x3e   : > { %410 = sbr.rel (%p1554_p4) target bundleno = 70 (0x46), region = 72 }
  0x3f   : > { %s970_s4 = sshll.u32 %s400_s3, 3 }
  0x40   : > { %s1467_s14 = scalar_lea.vmem %s1535_s0, %s970_s4  ;;  %s1472_s20 = scalar_lea.vmem %s1536_s1, %s970_s4 }
  0x43   : > { %v1289_v0 = vmov 0.0  }
  0x44   : > { %411 = vst [vmem:[#allocation2] sm:$0xff] %v1289_v0 }
  0x45   : > { %412 = vst [vmem:[#allocation3] sm:$0xff] %v1289_v0 }
  0x46 PF: > { %v461_v1 = vld [vmem:[#allocation7 + $0x168] sm:$0xff]  ;;  %v462_v2 = vld [vmem:[#allocation7 + $0x170] sm:$0xff]  ;;  %v459_v5 = vld [vmem:[#allocation7 + $0x158] sm:$0xff]  ;;  %s705_s9 = sadd.s32 1, %s1361_s12 }
  0x47   : > { %v569_v3 = vld [vmem:[#allocation9 + $0x168] sm:$0xff]  ;;  %464 = vmatpush.msra.mxu0 %v461_v1  ;;  %484 = vmatpush.msra.mxu1 %v462_v2  ;;  %v458_v4 = vld [vmem:[#allocation7 + $0x150] sm:$0xff]  ;;  %v455_v7 = vld [vmem:[#allocation7 + $0x138] sm:$0xff]  ;;  %p976_p1 = scmp.ge.s32.totalorder %s705_s9, 4 }
  0x48   : > { %v566_v6 = vld [vmem:[#allocation9 + $0x150] sm:$0xff]  ;;  %572 = vmatpush.msra.mxu3 %v569_v3  ;;  %v456_v8 = vld [vmem:[#allocation7 + $0x140] sm:$0xff]  ;;  %v563_v9 = vld [vmem:[#allocation9 + $0x138] sm:$0xff] }
  0x49   : > { %465 = vmatpush.msra.mxu0 %v458_v4  ;;  %485 = vmatpush.msra.mxu1 %v459_v5  ;;  %v452_v10 = vld [vmem:[#allocation7 + $0x120] sm:$0xff]  ;;  %v453_v11 = vld [vmem:[#allocation7 + $0x128] sm:$0xff]  ;;  %v450_v14 = vld [vmem:[#allocation7 + $0x110] sm:$0xff] }
  0x4a   : > { %573 = vmatpush.msra.mxu3 %v566_v6  ;;  %v560_v12 = vld [vmem:[#allocation9 + $0x120] sm:$0xff]  ;;  %v449_v13 = vld [vmem:[#allocation7 + $0x108] sm:$0xff]  ;;  %v446_v16 = vld [vmem:[#allocation7 + $0xf0] sm:$0xff] }
  0x4b   : > { %466 = vmatpush.msra.mxu0 %v455_v7  ;;  %486 = vmatpush.msra.mxu1 %v456_v8  ;;  %v557_v15 = vld [vmem:[#allocation9 + $0x108] sm:$0xff]  ;;  %v447_v17 = vld [vmem:[#allocation7 + $0xf8] sm:$0xff]  ;;  %v554_v18 = vld [vmem:[#allocation9 + $0xf0] sm:$0xff]  ;;  %v1290_v8 = vmov 0.0  }
  0x4c   : > { %574 = vmatpush.msra.mxu3 %v563_v9  ;;  %v443_v19 = vld [vmem:[#allocation7 + $0xd8] sm:$0xff]  ;;  %v444_v20 = vld [vmem:[#allocation7 + $0xe0] sm:$0xff]  ;;  %v441_v23 = vld [vmem:[#allocation7 + $0xc8] sm:$0xff] }
  0x4d   : > { %467 = vmatpush.msra.mxu0 %v452_v10  ;;  %487 = vmatpush.msra.mxu1 %v453_v11  ;;  %v551_v21 = vld [vmem:[#allocation9 + $0xd8] sm:$0xff]  ;;  %v440_v22 = vld [vmem:[#allocation7 + $0xc0] sm:$0xff]  ;;  %v437_v26 = vld [vmem:[#allocation7 + $0xa8] sm:$0xff]  ;;  %v1291_v11 = vmov 0  }
  0x4e   : > { %575 = vmatpush.msra.mxu3 %v560_v12  ;;  %v548_v24 = vld [vmem:[#allocation9 + $0xc0] sm:$0xff]  ;;  %v463_v25 = vld [vmem:[#allocation7 + $0x178] sm:$0xff]  ;;  %v438_v27 = vld [vmem:[#allocation7 + $0xb0] sm:$0xff]  ;;  %1068 = vset.pattern.permute.xlu0 %v1291_v11 }
  0x4f   : > { %468 = vmatpush.msra.mxu0 %v449_v13  ;;  %488 = vmatpush.msra.mxu1 %v450_v14  ;;  %v460_v28 = vld [vmem:[#allocation7 + $0x160] sm:$0xff]  ;;  %v545_v29 = vld [vmem:[#allocation9 + $0xa8] sm:$0xff]  ;;  %v434_v31 = vld [vmem:[#allocation7 + $0x90] sm:$0xff] }
  0x50   : > { %576 = vmatpush.msra.mxu3 %v557_v15  ;;  %504 = vmatpush.msra.mxu2 %v463_v25  ;;  %v457_v30 = vld [vmem:[#allocation7 + $0x148] sm:$0xff]  ;;  %v435_v32 = vld [vmem:[#allocation7 + $0x98] sm:$0xff]  ;;  %v542_v33 = vld [vmem:[#allocation9 + $0x90] sm:$0xff] }
  0x51   : > { %469 = vmatpush.msra.mxu0 %v446_v16  ;;  %489 = vmatpush.msra.mxu1 %v447_v17  ;;  %v454_v34 = vld [vmem:[#allocation7 + $0x130] sm:$0xff]  ;;  %v431_v35 = vld [vmem:[#allocation7 + $0x78] sm:$0xff]  ;;  %v432_v36 = vld [vmem:[#allocation7 + $0x80] sm:$0xff] }
  0x52   : > { %577 = vmatpush.msra.mxu3 %v554_v18  ;;  %505 = vmatpush.msra.mxu2 %v460_v28  ;;  %v539_v37 = vld [vmem:[#allocation9 + $0x78] sm:$0xff]  ;;  %v428_v39 = vld [vmem:[#allocation7 + $0x60] sm:$0xff]  ;;  %v429_v40 = vld [vmem:[#allocation7 + $0x68] sm:$0xff] }
  0x53   : > { %470 = vmatpush.msra.mxu0 %v443_v19  ;;  %490 = vmatpush.msra.mxu1 %v444_v20  ;;  %v451_v38 = vld [vmem:[#allocation7 + $0x118] sm:$0xff]  ;;  %v536_v41 = vld [vmem:[#allocation9 + $0x60] sm:$0xff]  ;;  %v425_v43 = vld [vmem:[#allocation7 + $0x48] sm:$0xff] }
  0x54   : > { %578 = vmatpush.msra.mxu3 %v551_v21  ;;  %506 = vmatpush.msra.mxu2 %v457_v30  ;;  %v448_v42 = vld [vmem:[#allocation7 + $0x100] sm:$0xff]  ;;  %v426_v44 = vld [vmem:[#allocation7 + $0x50] sm:$0xff]  ;;  %v533_v45 = vld [vmem:[#allocation9 + $0x48] sm:$0xff] }
  0x55   : > { %471 = vmatpush.msra.mxu0 %v440_v22  ;;  %491 = vmatpush.msra.mxu1 %v441_v23  ;;  %v445_v46 = vld [vmem:[#allocation7 + $0xe8] sm:$0xff]  ;;  %v422_v47 = vld [vmem:[#allocation7 + $0x30] sm:$0xff]  ;;  %v423_v48 = vld [vmem:[#allocation7 + $0x38] sm:$0xff] }
  0x56   : > { %579 = vmatpush.msra.mxu3 %v548_v24  ;;  %507 = vmatpush.msra.mxu2 %v454_v34  ;;  %v530_v49 = vld [vmem:[#allocation9 + $0x30] sm:$0xff]  ;;  %v419_v51 = vld [vmem:[#allocation7 + $0x18] sm:$0xff]  ;;  %v420_v52 = vld [vmem:[#allocation7 + $0x20] sm:$0xff] }
  0x57   : > { %472 = vmatpush.msra.mxu0 %v437_v26  ;;  %492 = vmatpush.msra.mxu1 %v438_v27  ;;  %v442_v50 = vld [vmem:[#allocation7 + $0xd0] sm:$0xff]  ;;  %v527_v53 = vld [vmem:[#allocation9 + $0x18] sm:$0xff]  ;;  %v416_v55 = vld [vmem:[#allocation7] sm:$0xff] }
  0x58   : > { %580 = vmatpush.msra.mxu3 %v545_v29  ;;  %508 = vmatpush.msra.mxu2 %v451_v38  ;;  %v439_v54 = vld [vmem:[#allocation7 + $0xb8] sm:$0xff]  ;;  %v417_v56 = vld [vmem:[#allocation7 + $0x8] sm:$0xff]  ;;  %v524_v57 = vld [vmem:[#allocation9] sm:$0xff] }
  0x59   : > { %473 = vmatpush.msra.mxu0 %v434_v31  ;;  %493 = vmatpush.msra.mxu1 %v435_v32  ;;  %v570_v58 = vld [vmem:[#allocation9 + $0x170] sm:$0xff]  ;;  %v1478_v59 = vld [vmem:[#allocation2] sm:$0xff]  ;;  %v571_v60 = vld [vmem:[#allocation9 + $0x178] sm:$0xff] }
  0x5a   : > { %581 = vmatpush.msra.mxu3 %v542_v33  ;;  %509 = vmatpush.msra.mxu2 %v448_v42  ;;  %v632_v61 = vld [vmem:[%s1472_s20] sm:$0xff]  ;;  %v567_v62 = vld [vmem:[#allocation9 + $0x158] sm:$0xff]  ;;  %v433_v3 = vld [vmem:[#allocation7 + $0x88] sm:$0xff] }
  0x5b   : > { %474 = vmatpush.msra.mxu0 %v431_v35  ;;  %494 = vmatpush.msra.mxu1 %v432_v36  ;;  %v436_v63 = vld [vmem:[#allocation7 + $0xa0] sm:$0xff]  ;;  %vm633_vm0 = vcmp.gt.f32.partialorder %v632_v61, 0.0  ;;  %v565_v4 = vld [vmem:[#allocation9 + $0x148] sm:$0xff]  ;;  %v430_v6 = vld [vmem:[#allocation7 + $0x70] sm:$0xff] }
  0x5c   : > { %582 = vmatpush.msra.mxu3 %v539_v37  ;;  %510 = vmatpush.msra.mxu2 %v445_v46  ;;  %v568_v0 = vld [vmem:[#allocation9 + $0x160] sm:$0xff]  ;;  %v561_v5 = vld [vmem:[#allocation9 + $0x128] sm:$0xff]  ;;  %v562_v7 = vld [vmem:[#allocation9 + $0x130] sm:$0xff]  ;;  %v973_v9 = vsel %vm633_vm0, 1.0, %v1290_v8 }
  0x5d   : > { %475 = vmatpush.msra.mxu0 %v428_v39  ;;  %495 = vmatpush.msra.mxu1 %v429_v40  ;;  %v415_v1 = vld [vmem:[%s1467_s14] sm:$0xff]  ;;  %v558_v10 = vld [vmem:[#allocation9 + $0x110] sm:$0xff]  ;;  %v427_v12 = vld [vmem:[#allocation7 + $0x58] sm:$0xff] }
  0x5e   : > { %583 = vmatpush.msra.mxu3 %v536_v41  ;;  %511 = vmatpush.msra.mxu2 %v442_v50  ;;  %v564_v2 = vld [vmem:[#allocation9 + $0x140] sm:$0xff]  ;;  %v559_v13 = vld [vmem:[#allocation9 + $0x118] sm:$0xff]  ;;  %v421_v18 = vld [vmem:[#allocation7 + $0x28] sm:$0xff] }
  0x5f   : > { %476 = vmatpush.msra.mxu0 %v425_v43  ;;  %496 = vmatpush.msra.mxu1 %v426_v44  ;;  %v555_v14 = vld [vmem:[#allocation9 + $0xf8] sm:$0xff]  ;;  %v424_v15 = vld [vmem:[#allocation7 + $0x40] sm:$0xff]  ;;  %v553_v19 = vld [vmem:[#allocation9 + $0xe8] sm:$0xff] }
  0x60   : > { %584 = vmatpush.msra.mxu3 %v533_v45  ;;  %512 = vmatpush.msra.mxu2 %v439_v54  ;;  %v556_v16 = vld [vmem:[#allocation9 + $0x100] sm:$0xff]  ;;  %v549_v20 = vld [vmem:[#allocation9 + $0xc8] sm:$0xff]  ;;  %v550_v21 = vld [vmem:[#allocation9 + $0xd0] sm:$0xff] }
  0x61   : > { %477 = vmatpush.msra.mxu0 %v422_v47  ;;  %497 = vmatpush.msra.mxu1 %v423_v48  ;;  %v552_v17 = vld [vmem:[#allocation9 + $0xe0] sm:$0xff]  ;;  %v418_v22 = vld [vmem:[#allocation7 + $0x10] sm:$0xff]  ;;  %v547_v24 = vld [vmem:[#allocation9 + $0xb8] sm:$0xff] }
  0x62   : > { %585 = vmatpush.msra.mxu3 %v530_v49  ;;  %513 = vmatpush.msra.mxu2 %v436_v63  ;;  %v546_v23 = vld [vmem:[#allocation9 + $0xb0] sm:$0xff]  ;;  %v543_v25 = vld [vmem:[#allocation9 + $0x98] sm:$0xff]  ;;  %v544_v26 = vld [vmem:[#allocation9 + $0xa0] sm:$0xff] }
  0x63   : > { %478 = vmatpush.msra.mxu0 %v419_v51  ;;  %498 = vmatpush.msra.mxu1 %v420_v52  ;;  %v540_v27 = vld [vmem:[#allocation9 + $0x80] sm:$0xff]  ;;  %v541_v28 = vld [vmem:[#allocation9 + $0x88] sm:$0xff]  ;;  %v538_v30 = vld [vmem:[#allocation9 + $0x70] sm:$0xff] }
  0x64   : > { %586 = vmatpush.msra.mxu3 %v527_v53  ;;  %514 = vmatpush.msra.mxu2 %v433_v3  ;;  %v537_v29 = vld [vmem:[#allocation9 + $0x68] sm:$0xff]  ;;  %v534_v31 = vld [vmem:[#allocation9 + $0x50] sm:$0xff]  ;;  %v535_v32 = vld [vmem:[#allocation9 + $0x58] sm:$0xff] }
  0x65   : > { %479 = vmatpush.msra.mxu0 %v416_v55  ;;  %499 = vmatpush.msra.mxu1 %v417_v56  ;;  %v531_v33 = vld [vmem:[#allocation9 + $0x38] sm:$0xff]  ;;  %v532_v34 = vld [vmem:[#allocation9 + $0x40] sm:$0xff]  ;;  %v529_v36 = vld [vmem:[#allocation9 + $0x28] sm:$0xff] }
  0x66   : > { %587 = vmatpush.msra.mxu3 %v524_v57  ;;  %480 = vmatmul.f32.vlgmr.msra.gmra.mxu0 %v415_v1  ;;  %v528_v35 = vld [vmem:[#allocation9 + $0x20] sm:$0xff]  ;;  %v525_v37 = vld [vmem:[#allocation9 + $0x8] sm:$0xff]  ;;  %v526_v38 = vld [vmem:[#allocation9 + $0x10] sm:$0xff] }
  0x67   : > { %592 = vmatpush.msrb.mxu0 %v570_v58  ;;  %588 = vmatmul.f32.vlgmr.msra.gmra.mxu3 %v1478_v59  ;;  %v650_v41 = vld [vmem:[%s1541_s6] sm:$0x7] }
  0x68   : > { %612 = vmatpush.msrb.mxu1 %v571_v60  ;;  %515 = vmatpush.msra.mxu2 %v430_v6  ;;  %v652_v44 = vperm.slane %v650_v41, 0  ;;  %v653_v60 = vperm.slane %v650_v41, 1  ;;  %v654_v63 = vperm.slane %v650_v41, 2 }
  0x69   : > { %593 = vmatpush.msrb.mxu0 %v567_v62  ;;  %641 = vperm.xlu0 %1068, %v973_v9  }
  0x6a   : > { %613 = vmatpush.msrb.mxu1 %v568_v0  ;;  %516 = vmatpush.msra.mxu2 %v427_v12 }
  0x6b   : > { %594 = vmatpush.msrb.mxu0 %v564_v2  ;;  %500 = vmatmul.f32.vlgmr.msra.gmra.mxu1 %v415_v1 }
  0x6c   : > { %614 = vmatpush.msrb.mxu1 %v565_v4  ;;  %517 = vmatpush.msra.mxu2 %v424_v15 }
  0x6d   : > { %595 = vmatpush.msrb.mxu0 %v561_v5 }
  0x6e   : > { %615 = vmatpush.msrb.mxu1 %v562_v7  ;;  %518 = vmatpush.msra.mxu2 %v421_v18 }
  0x6f   : > { %596 = vmatpush.msrb.mxu0 %v558_v10 }
  0x70   : > { %616 = vmatpush.msrb.mxu1 %v559_v13  ;;  %519 = vmatpush.msra.mxu2 %v418_v22 }
  0x71   : > { %597 = vmatpush.msrb.mxu0 %v555_v14  ;;  %520 = vmatmul.f32.vlgmr.msra.gmra.mxu2 %v415_v1 }
  0x72   : > { %617 = vmatpush.msrb.mxu1 %v556_v16  ;;  %v414_v16 = vld [vmem:[#allocation3] sm:$0xff] }
  0x73   : > { %598 = vmatpush.msrb.mxu0 %v552_v17 }
  0x74   : > { %618 = vmatpush.msrb.mxu1 %v553_v19 }
  0x75   : > { %599 = vmatpush.msrb.mxu0 %v549_v20 }
  0x76   : > { %619 = vmatpush.msrb.mxu1 %v550_v21 }
  0x77   : > { %600 = vmatpush.msrb.mxu0 %v546_v23 }
  0x78   : > { %620 = vmatpush.msrb.mxu1 %v547_v24 }
  0x79   : > { %601 = vmatpush.msrb.mxu0 %v543_v25 }
  0x7a   : > { %621 = vmatpush.msrb.mxu1 %v544_v26 }
  0x7b   : > { %602 = vmatpush.msrb.mxu0 %v540_v27 }
  0x7c   : > { %622 = vmatpush.msrb.mxu1 %v541_v28 }
  0x7d   : > { %603 = vmatpush.msrb.mxu0 %v537_v29 }
  0x7e   : > { %623 = vmatpush.msrb.mxu1 %v538_v30 }
  0x7f   : > { %604 = vmatpush.msrb.mxu0 %v534_v31 }
  0x80   : > { %624 = vmatpush.msrb.mxu1 %v535_v32 }
  0x81   : > { %605 = vmatpush.msrb.mxu0 %v531_v33 }
  0x82   : > { %625 = vmatpush.msrb.mxu1 %v532_v34 }
  0x83   : > { %606 = vmatpush.msrb.mxu0 %v528_v35 }
  0x84   : > { %626 = vmatpush.msrb.mxu1 %v529_v36 }
  0x85   : > { %607 = vmatpush.msrb.mxu0 %v525_v37 }
  0x86   : > { %627 = vmatpush.msrb.mxu1 %v526_v38  ;;  %608 = vmatmul.f32.vlgmr.msrb.gmra.mxu0 %v1478_v59 }
  0x87   : > { %628 = vmatmul.f32.vlgmr.msrb.gmra.mxu1 %v1478_v59 }
  0xdb   : > { %v642_v42 = vpop.permute.xlu0 %641 }
  0xe3   : > { %v481_v39 = vpop.f32.mrf.mxu0 }
  0xe8   : > { %v501_v49 = vpop.f32.mrf.mxu1 }
  0xea   : > { %v589_v40 = vpop.f32.mrf.mxu3 }
  0xeb   : > { %v636_v43 = vsub.f32 %v589_v40, %v481_v39 }
  0xed   : > { %v644_v45 = vmul.f32 %v642_v42, %v636_v43 }
  0xef   : > { %v647_v46 = vadd.f32 %v644_v45, %v481_v39 }
  0xf1   : > { %v658_v47 = vadd.f32 %v652_v44, %v647_v46 }
  0xf3   : > { %v974_v48 = vmul.f32 -1.442695, %v658_v47 }
  0xf4   : > { %v521_v52 = vpop.f32.mrf.mxu2 }
  0xf5   : > { %1069 = vpow2.f32 %v974_v48 }
  0xfb   : > { %v1070_v50 = vpop.eup %1069 }
  0xfc   : > { %v664_v51 = vadd.f32 1.0, %v1070_v50 }
  0xfe   : > { %1071 = vrcp.f32 %v664_v51  ;;  %vm670_vm1 = vweird.f32 %v664_v51  ;;  %v676_v7 = vand.u32 2147483648, %v664_v51  ;;  %v674_v8 = vand.u32 2147483647, %v664_v51 }
 0x100   : > { %v677_v13 = vor.u32 1.1754944e-38, %v676_v7  ;;  %vm675_vm4 = vcmp.eq.f32.partialorder %v674_v8, 8.507059e+37 }
 0x103   : > { %v609_v53 = vpop.f32.mrf.mxu0 }
 0x104   : > { %v637_v54 = vsub.f32 %v609_v53, %v501_v49  ;;  %v629_v55 = vpop.f32.mrf.mxu1  ;;  %v1072_v56 = vpop.eup %1071 }
 0x105   : > { %v638_v57 = vsub.f32 %v629_v55, %v521_v52  ;;  %v666_v58 = vmul.f32 %v1072_v56, %v664_v51  ;;  %vm671_vm2 = vweird.f32 %v1072_v56 }
 0x106   : > { %v645_v59 = vmul.f32 %v642_v42, %v637_v54  ;;  %vm672_vm3 = vmor %vm670_vm1, %vm671_vm2 }
 0x107   : > { %v646_v61 = vmul.f32 %v642_v42, %v638_v57  ;;  %v667_v0 = vsub.f32 1.0, %v666_v58 }
 0x108   : > { %v648_v62 = vadd.f32 %v645_v59, %v501_v49 }
 0x109   : > { %v649_v1 = vadd.f32 %v646_v61, %v521_v52  ;;  %v668_v5 = vmul.f32 %v1072_v56, %v667_v0 }
 0x10a   : > { %v659_v2 = vadd.f32 %v653_v60, %v648_v62 }
 0x10b   : > { %v660_v4 = vadd.f32 %v654_v63, %v649_v1  ;;  %v669_v6 = vadd.f32 %v1072_v56, %v668_v5 }
 0x10c   : > { %v975_v3 = vmul.f32 -1.442695, %v659_v2 }
 0x10d   : > { %v673_v11 = vsel %vm672_vm3, %v1072_v56, %v669_v6 }
 0x10e   : > { %1073 = vpow2.f32 %v975_v3  ;;  %v678_v14 = vsel %vm675_vm4, %v677_v13, %v673_v11 }
 0x10f   : > { %1075 = vtanh.f32 %v660_v4 }
 0x114   : > { %v1074_v9 = vpop.eup %1073 }
 0x115   : > { %v683_v10 = vadd.f32 1.0, %v1074_v9  ;;  %v1076_v12 = vpop.eup %1075 }
 0x116   : > { %v700_v15 = vmul.f32 %v1076_v12, %v678_v14 }
 0x117   : > { %1077 = vrcp.f32 %v683_v10  ;;  %v695_v21 = vand.u32 2147483648, %v683_v10  ;;  %v693_v23 = vand.u32 2147483647, %v683_v10  ;;  %vm689_vm6 = vweird.f32 %v683_v10 }
 0x118   : > { %v1489_v18 = vadd.f32 %v700_v15, %v414_v16 }
 0x119   : > { %v696_v25 = vor.u32 1.1754944e-38, %v695_v21  ;;  %vm694_vm8 = vcmp.eq.f32.partialorder %v693_v23, 8.507059e+37 }
 0x11a   : > { %1079 = vtanh.f32 %v1489_v18 }
 0x11d   : > { %v1078_v17 = vpop.eup %1077 }
 0x11e   : > { %v685_v19 = vmul.f32 %v1078_v17, %v683_v10  ;;  %vm690_vm5 = vweird.f32 %v1078_v17 }
 0x11f   : > { %vm691_vm7 = vmor %vm689_vm6, %vm690_vm5 }
 0x120   : > { %v686_v20 = vsub.f32 1.0, %v685_v19  ;;  %v1080_v27 = vpop.eup %1079 }
 0x122   : > { %v687_v22 = vmul.f32 %v1078_v17, %v686_v20 }
 0x124   : > { %v688_v24 = vadd.f32 %v1078_v17, %v687_v22 }
 0x126   : > { %v692_v26 = vsel %vm691_vm7, %v1078_v17, %v688_v24  ;;  %709 = sbr.rel (%p976_p1) target bundleno = 623 (0x26f), region = 76 }
 0x127   : > { %v697_v28 = vsel %vm694_vm8, %v696_v25, %v692_v26 }
 0x128   : > { %v703_v29 = vmul.f32 %v1080_v27, %v697_v28 }
 0x12a   : > { %704 = vst [vmem:[%s1474_s24] sm:$0xff] %v703_v29 }
 0x12b   : > { %v725_v30 = vld [vmem:[#allocation10 + $0x78] sm:$0xff]  ;;  %v724_v31 = vld [vmem:[#allocation10 + $0x70] sm:$0xff]  ;;  %789 = vmatpush.msra.mxu1 %v703_v29  ;;  %v723_v32 = vld [vmem:[#allocation10 + $0x68] sm:$0xff]  ;;  %vm770_vm9 = vcmask 64512  }
 0x12c   : > { %730 = vmatpush.msra.mxu0 %v725_v30  ;;  %v722_v33 = vld [vmem:[#allocation10 + $0x60] sm:$0xff]  ;;  %v721_v34 = vld [vmem:[#allocation10 + $0x58] sm:$0xff]  ;;  %v720_v35 = vld [vmem:[#allocation10 + $0x50] sm:$0xff] }
 0x12d   : > { %v719_v36 = vld [vmem:[#allocation10 + $0x48] sm:$0xff]  ;;  %v718_v37 = vld [vmem:[#allocation10 + $0x40] sm:$0xff]  ;;  %v717_v38 = vld [vmem:[#allocation10 + $0x38] sm:$0xff] }
 0x12e   : > { %731 = vmatpush.msra.mxu0 %v724_v31  ;;  %v716_v39 = vld [vmem:[#allocation10 + $0x30] sm:$0xff]  ;;  %v715_v40 = vld [vmem:[#allocation10 + $0x28] sm:$0xff]  ;;  %v714_v41 = vld [vmem:[#allocation10 + $0x20] sm:$0xff] }
 0x12f   : > { %v713_v42 = vld [vmem:[#allocation10 + $0x18] sm:$0xff]  ;;  %v712_v43 = vld [vmem:[#allocation10 + $0x10] sm:$0xff]  ;;  %v711_v44 = vld [vmem:[#allocation10 + $0x8] sm:$0xff] }
 0x130   : > { %732 = vmatpush.msra.mxu0 %v723_v32  ;;  %v710_v45 = vld [vmem:[#allocation10] sm:$0xff]  ;;  %v769_v49 = vld [vmem:[%s1448_s26] sm:$0xff] }
 0x131   : > { %v1081_v46 = vld [vmem:[%s1542_s7] ss:$0 sm:$0xff]  ;;  %978 = vmatmul.msk.f32.vlgmr.msra.gmra.mxu1 %vm770_vm9, %v769_v49 }
 0x132   : > { %733 = vmatpush.msra.mxu0 %v722_v33 }
 0x134   : > { %734 = vmatpush.msra.mxu0 %v721_v34 }
 0x136   : > { %735 = vmatpush.msra.mxu0 %v720_v35 }
 0x138   : > { %736 = vmatpush.msra.mxu0 %v719_v36 }
 0x13a   : > { %737 = vmatpush.msra.mxu0 %v718_v37 }
 0x13c   : > { %738 = vmatpush.msra.mxu0 %v717_v38 }
 0x13e   : > { %739 = vmatpush.msra.mxu0 %v716_v39 }
 0x140   : > { %740 = vmatpush.msra.mxu0 %v715_v40 }
 0x142   : > { %741 = vmatpush.msra.mxu0 %v714_v41 }
 0x144   : > { %742 = vmatpush.msra.mxu0 %v713_v42 }
 0x146   : > { %743 = vmatpush.msra.mxu0 %v712_v43 }
 0x148   : > { %744 = vmatpush.msra.mxu0 %v711_v44 }
 0x14a   : > { %745 = vmatpush.msra.mxu0 %v710_v45 }
 0x14b   : > { %746 = vmatmul.f32.vlgmr.msra.gmra.mxu0 %v703_v29 }
 0x1ae   : > { %v791_v0 = vpop.f32.mrf.mxu1 }
 0x1af   : > { %794 = vst [vmem:[#allocation2] sm:$0xff] %v791_v0 }
 0x1c8   : > { %v747_v47 = vpop.f32.mrf.mxu0 }
 0x1c9   : > { %v748_v48 = vadd.f32 %v1081_v46, %v747_v47 }
 0x1cb   : > { %v977_v50 = vmul.f32 -1.442695, %v748_v48 }
 0x1cd   : > { %1082 = vpow2.f32 %v977_v50 }
 0x1d3   : > { %v1083_v51 = vpop.eup %1082 }
 0x1d4   : > { %v753_v52 = vadd.f32 1.0, %v1083_v51 }
 0x1d6   : > { %1084 = vrcp.f32 %v753_v52  ;;  %v765_v56 = vand.u32 2147483648, %v753_v52  ;;  %v763_v58 = vand.u32 2147483647, %v753_v52  ;;  %vm759_vm11 = vweird.f32 %v753_v52 }
 0x1d8   : > { %v766_v60 = vor.u32 1.1754944e-38, %v765_v56  ;;  %vm764_vm13 = vcmp.eq.f32.partialorder %v763_v58, 8.507059e+37 }
 0x1dc   : > { %v1085_v53 = vpop.eup %1084 }
 0x1dd   : > { %v755_v54 = vmul.f32 %v1085_v53, %v753_v52  ;;  %vm760_vm10 = vweird.f32 %v1085_v53 }
 0x1de   : > { %vm761_vm12 = vmor %vm759_vm11, %vm760_vm10 }
 0x1df   : > { %v756_v55 = vsub.f32 1.0, %v755_v54 }
 0x1e1   : > { %v757_v57 = vmul.f32 %v1085_v53, %v756_v55 }
 0x1e3   : > { %v758_v59 = vadd.f32 %v1085_v53, %v757_v57 }
 0x1e5   : > { %v762_v61 = vsel %vm761_vm12, %v1085_v53, %v758_v59 }
 0x1e6   : > { %v767_v62 = vsel %vm764_vm13, %v766_v60, %v762_v61 }
 0x1e7   : > { %v795_v63 = vmul.f32 %v767_v62, %v1489_v18 }
 0x1e9   : > { %811 = vmatpush.msra.mxu2 %v795_v63 }
 0x1ea   : > { %979 = vmatmul.msk.f32.vlgmr.msra.gmra.mxu2 %vm770_vm9, %v769_v49 }
 0x26d   : > { %v813_v1 = vpop.f32.mrf.mxu2 }
 0x26e   : > { %816 = vst [vmem:[#allocation3] sm:$0xff] %v813_v1 }
 0x26f PF: > { %s981_s26 = sshll.u32 %s1361_s12, 3  ;;  %s830_s14 = sshll.u32 %s1474_s24, 4  ;;  %s831_s14 = int_to_ptr.vmem [resolvable:$true] %s830_s14 }
 0x270   : > { %s828_s19 = scalar_lea.hbm %s1543_s8, %s981_s26  ;;  %s818_s17 = scalar_lea.sflag [#allocation6], %s1444_s22 }
 0x271   : > { %s832_s15 = sshll.u32 %s828_s19, 4  ;;  %s1226_s12 = scalar_lea.hbm %s1543_s8, 32  ;;  %s833_s15 = int_to_ptr.hbm [resolvable:$true] %s832_s15 }
 0x272   : > { %s1220_s20 = sshra.s32 %s833_s15, 4  ;;  %s1221_s20 = int_to_ptr.hbm [resolvable:$true] %s1220_s20 }
 0x273   : > { %s1222_s9 = scalar_lea.hbm %s1221_s20, 8  ;;  %p1227_p9 = scmp.lt.s32.totalorder %s1221_s20, %s1543_s8 }
 0x274   : > { %p1223_p12 = scmp.ne.s32.totalorder %s1221_s20, %s1222_s9  ;;  %p1228_p10 = scmp.lt.s32.totalorder %s1226_s12, %s1222_s9 }
 0x276   : > { %p1224_p8 = pnand %p1223_p12, %p1413_p13  ;;  %p1229_p11 = por %p1228_p10, %p1227_p9 }
 0x278   : > { %p1225_p7 = pneg %p1224_p8 }
 0x27a   : > { %p1230_p0 = pnand %p1229_p11, %p1225_p7 }
 0x27c   : > { %1233 = shalt.err (!%p1230_p0)
}
 0x27d   : > { %998 = dma.vmem_to_hbm [thread:$0]  (%p1413_p13), %s831_s14, 128, %s833_s15, %s818_s17  }
 0x27e PF: > { %p1025_p2 = scmp.ge.s32.totalorder %s1280_s30, 2  ;;  %s844_s22 = sand.u32 1, %s1268_s27  }
 0x27f   : > { %s845_s24 = scalar_lea.sflag [#allocation6], %s844_s22 }
 0x280   : > { %p1015_p6 = pnand %p1025_p2, %p1418_p5 }
 0x282   : > { %p1016_p3 = pneg %p1015_p6 }
 0x284   : > { %1263 = dma.done.wait (%p1016_p3), %s845_s24, 128  }
 0x285   : > { %1265 = vsyncadd (%p1016_p3), %s845_s24, 4294967168  ;;  %p23_p4 = scmp.ge.s32.totalorder %s1393_s11, 6   ;;  %s1555_s27 = smov %s1272_s28 }
 0x286   : > { %s1556_s28 = smov %s1276_s29  ;;  %s1557_s29 = smov %s1405_s18 }
 0x287   : > { %s1558_s30 = smov %s1393_s11  ;;  %25 = sbr.rel (!%p23_p4) target bundleno = 10 (0xa), region = 123 }
 0x28c   :  { %851 = vsyncpa [#allocation5], 1 }
 0x28d   :  { %853 = vsyncpa [#allocation5 + $0x1], 1 }
 0x28e   :  { %854 = vsyncpa [#allocation8], 1 }
 0x28f   :  { %855 = vsyncpa [#allocation11], 1 }
 0x290   :  { %856 = vsyncpa [#allocation6], 1 }
 0x291   :  { %858 = vsyncpa [#allocation6 + $0x1], 1 }

</bundles_post_ra>
